<compile_context>
chip_gen: v5e
topology: v5e:2x2
jax: 0.10.0
libtpu: 0.0.40
codegen_flags: <defaults>
</compile_context>

<pallas_src>
import jax
import jax.numpy as jnp
from jax.experimental import pallas as pl
from jax.experimental.pallas import tpu as pltpu

EPS = 1e-5  # nn.BatchNorm1d default eps


# -----------------------------------------------------------------------------------
# kernels
# -----------------------------------------------------------------------------------
def _conv_stats_kernel(x_ref, w_ref, stats_ref):
    """Pass 1 (recompute path): conv on one row tile + per-channel sum / sum-of-squares.

    x_ref:     (tp, 2*KC)  im2col features; lanes [0:KC) = even position, [KC:2KC) = odd
    w_ref:     (KC, CP)    weights, output channels zero-padded to CP (multiple of 128)
    stats_ref: (1, 2, CP)  per-tile partials: row 0 = sum, row 1 = sum of squares
    """
    kc = w_ref.shape[0]
    cp = w_ref.shape[1]
    w = w_ref[...]
    acc_e = jnp.dot(x_ref[:, :kc], w, preferred_element_type=jnp.float32)
    acc_o = jnp.dot(x_ref[:, kc:], w, preferred_element_type=jnp.float32)
    s = jnp.sum(acc_e, axis=0, keepdims=True) + jnp.sum(acc_o, axis=0, keepdims=True)
    ss = (jnp.sum(acc_e * acc_e, axis=0, keepdims=True)
          + jnp.sum(acc_o * acc_o, axis=0, keepdims=True))
    stats_ref[...] = jnp.concatenate([s, ss], axis=0).reshape(1, 2, cp)


def _conv_stats_store_kernel(x_ref, w_ref, stats_ref, y_ref):
    """Pass 1 (store_conv path): as above, but also stores the pre-BN conv result.

    y_ref: (tp, 2*CP)  lanes [0:CP) = even-position conv, [CP:2CP) = odd-position conv
    """
    kc = w_ref.shape[0]
    cp = w_ref.shape[1]
    w = w_ref[...]
    acc_e = jnp.dot(x_ref[:, :kc], w, preferred_element_type=jnp.float32)
    acc_o = jnp.dot(x_ref[:, kc:], w, preferred_element_type=jnp.float32)
    s = jnp.sum(acc_e, axis=0, keepdims=True) + jnp.sum(acc_o, axis=0, keepdims=True)
    ss = (jnp.sum(acc_e * acc_e, axis=0, keepdims=True)
          + jnp.sum(acc_o * acc_o, axis=0, keepdims=True))
    stats_ref[...] = jnp.concatenate([s, ss], axis=0).reshape(1, 2, cp)
    y_ref[...] = jnp.concatenate([acc_e, acc_o], axis=-1).astype(y_ref.dtype)


def _conv_bn_relu_pool_kernel(x_ref, w_ref, shift_ref, out_ref):
    """Pass 2 (recompute path): conv with BN-scale-folded weights + shift + ReLU + pool.

    x_ref:     (tp, 2*KC)  same im2col layout as pass 1
    w_ref:     (KC, CP)    weights pre-multiplied by gamma * rsqrt(var + eps)
    shift_ref: (1, CP)     beta - mean * scale
    out_ref:   (tp, CP)    one pooled row per input row-pair
    """
    kc = w_ref.shape[0]
    w = w_ref[...]
    shift = shift_ref[...]
    y_e = jnp.dot(x_ref[:, :kc], w, preferred_element_type=jnp.float32) + shift
    y_o = jnp.dot(x_ref[:, kc:], w, preferred_element_type=jnp.float32) + shift
    # relu(max(a, b)) == max(relu(a), relu(b)): one VPU pass for ReLU + pool.
    out_ref[...] = jnp.maximum(jnp.maximum(y_e, y_o), 0.0).astype(out_ref.dtype)


def _bn_relu_pool_kernel(y_ref, scale_ref, shift_ref, out_ref):
    """Pass 2 (store_conv path): elementwise BN FMA + ReLU + MaxPool(2).

    y_ref: (tp, 2*CP)  pre-BN conv from pass 1 (even | odd on lanes, 128-aligned split)
    """
    cp = scale_ref.shape[-1]
    scale = scale_ref[...]
    shift = shift_ref[...]
    y = y_ref[...].astype(jnp.float32)
    y_e = y[:, :cp] * scale + shift
    y_o = y[:, cp:] * scale + shift
    out_ref[...] = jnp.maximum(jnp.maximum(y_e, y_o), 0.0).astype(out_ref.dtype)


# -----------------------------------------------------------------------------------
# tiling / hardware helpers
# -----------------------------------------------------------------------------------
def _round_up(x, m):
    return -(-x // m) * m


def _hw_defaults():
    """Return (scoped VMEM limit, row-tile target in pairs, prefer an even grid split)."""
    vmem_phys = None
    try:
        vmem_phys = getattr(pltpu.get_tpu_info(), "vmem_capacity_bytes", None)
    except Exception:
        vmem_phys = None
    if vmem_phys is None:
        try:
            kind = jax.devices()[0].device_kind.lower()
        except Exception:
            kind = ""
        if "v7" in kind:
            vmem_phys = 64 << 20
        elif "v6" in kind or "v5" in kind or "v4" in kind:
            vmem_phys = 128 << 20
        else:
            vmem_phys = 64 << 20            # unknown generation: stay conservative
    if vmem_phys >= (100 << 20):            # v4 / v5e / v6e: 128 MiB physical VMEM
        return 96 << 20, 1024, False
    return 32 << 20, 512, True              # v7x: 64 MiB per TC, 2 TCs share the grid


def _plan_row_tiling(n_pairs, row_align, bytes_per_pair_row, target, vmem_budget,
                     prefer_even_split):
    """Pick (pairs_per_tile, num_tiles); caller zero-pads rows to num_tiles * tile."""
    # Rough cap so the per-tile working set (double-buffered x / conv / out tiles)
    # stays well inside the scoped-VMEM budget.
    cap = max(row_align, (vmem_budget // 4) // max(bytes_per_pair_row, 1))
    tp = min(target, cap, _round_up(n_pairs, row_align))
    tp = max(row_align, tp - tp % row_align)
    nt = -(-n_pairs // tp)
    if prefer_even_split:
        # v7x: two TensorCores share the ("parallel",) grid axis -> want >= 2 and an
        # even number of grid steps so neither core idles.
        if nt == 1 and n_pairs > row_align:
            nt = 2
        if nt > 1 and nt % 2:
            nt += 1
    # Re-balance the tile size so the zero-row padding stays minimal.
    tp = max(row_align, _round_up(-(-n_pairs // nt), row_align))
    return tp, nt


def _invariant_spec(block_shape, single_buffer):
    index_map = lambda i: (0,) * len(block_shape)
    if single_buffer:
        # Grid-invariant operands only need one VMEM buffer; reclaiming the second
        # buffer matters most inside v7x's 64 MiB / TC budget.
        return pl.BlockSpec(block_shape, index_map, pipeline_mode=pl.Buffered(1))
    return pl.BlockSpec(block_shape, index_map)


# -----------------------------------------------------------------------------------
# wrapper
# -----------------------------------------------------------------------------------
def conv_block(x, w, b, gamma, beta, *, padding=1, compute_dtype=jnp.bfloat16,
               pairs_per_tile=None, store_conv=None, single_buffer_invariants=False):
    """x: (N, Cin, L) NCL (PyTorch Conv1d layout).  Returns (N, Cout, L//2) in x.dtype.

    compute_dtype: matmul-operand / stored-activation dtype (default bfloat16; pass
        None for strict float32).  Accumulation and BN/ReLU math are always float32.
    store_conv: if True, pass 1 also writes the pre-BN conv activations and pass 2 is a
        pure elementwise kernel (no im2col re-read, no conv recompute).  Default: auto,
        enabled when K*Cin > 2*CP.
    """
    N, Cin, L = x.shape
    Cout, Cin_w, K = w.shape
    assert Cin_w == Cin
    assert 2 * padding == K - 1, "conv_block assumes 'same' convolution (2*padding == K-1)"
    assert L % 2 == 0, "MaxPool1d(2): L must be even"

    NL = N * L
    NP = NL // 2                        # pooling pairs (= pooled output rows)
    KC = K * Cin                        # im2col contraction depth
    CP = 128 * pl.cdiv(Cout, 128)       # lane-dense (128-padded) channel count

    op_dtype = jnp.dtype(jnp.float32) if compute_dtype is None else jnp.dtype(compute_dtype)
    op_bytes = op_dtype.itemsize
    row_align = max(8, 8 * (4 // op_bytes))      # sublane granularity per operand dtype

    if store_conv is None:
        # Re-reading the 2*KC-wide im2col in pass 2 costs more HBM than writing +
        # reading the 2*CP-wide pre-BN conv once KC is comfortably larger than CP.
        store_conv = KC > 2 * CP

    vmem_limit, tile_target, even_split = _hw_defaults()

    # ---- wrapper-side layout plumbing (XLA, runs once) ---------------------------
    # Cast FIRST so the K*Cin-inflated im2col (dominant HBM object, read by both
    # passes) is built, stored and re-read at op_dtype width (2 B/elt for bf16).
    x_nlc = jnp.transpose(x.astype(op_dtype), (0, 2, 1))             # (N, L, Cin)
    x_pad = jnp.pad(x_nlc, ((0, 0), (padding, padding), (0, 0)))     # (N, L+K-1, Cin)
    cols = [x_pad[:, k:k + L, :] for k in range(K)]                  # K x (N, L, Cin)
    x_col = jnp.concatenate(cols, axis=-1).reshape(NL, KC)           # (N*L, K*Cin)
    # Each pooling pair (even l, odd l) sits side by side on the lane axis so the
    # kernel never needs a strided / sublane-pair read for the pool.
    x_pairs = x_col.reshape(NP, 2 * KC)

    # weights: (Cout, Cin, K) -> (K*Cin, Cout) matching the im2col feature order,
    # channels zero-padded to CP.  The f32 master copy is kept for the BN-scale fold.
    w_k = jnp.transpose(w, (2, 1, 0)).reshape(KC, Cout)
    w_f32 = jnp.pad(w_k.astype(jnp.float32), ((0, 0), (0, CP - Cout)))
    w_p = w_f32.astype(op_dtype)

    # The conv bias is exactly cancelled by the BN mean subtraction (training-mode
    # batch statistics), so neither pass ever loads it.
    del b

    # ---- row tiling: zero-pad pair rows up to a whole number of tiles ------------
    per_row_bytes = op_bytes * (2 * KC + CP + (2 * CP if store_conv else 0))
    if pairs_per_tile is not None:
        tp = max(row_align, _round_up(pairs_per_tile, row_align))
        nt = -(-NP // tp)
    else:
        tp, nt = _plan_row_tiling(NP, row_align, per_row_bytes, tile_target,
                                  vmem_limit, even_split)
    NP_pad = nt * tp
    if NP_pad != NP:
        # Zero rows contribute 0 to sum / sum-of-squares (divisor below is the true
        # N*L) and the padded output rows are sliced off, so statistics stay exact.
        x_pairs = jnp.pad(x_pairs, ((0, NP_pad - NP), (0, 0)))

    cparams = pltpu.CompilerParams(
        dimension_semantics=("parallel",),
        vmem_limit_bytes=vmem_limit,
    )

    x_spec = pl.BlockSpec((tp, 2 * KC), lambda i: (i, 0))
    w_spec = _invariant_spec((KC, CP), single_buffer_invariants)
    vec_spec = _invariant_spec((1, CP), single_buffer_invariants)
    stats_spec = pl.BlockSpec((1, 2, CP), lambda i: (i, 0, 0))
    out_spec = pl.BlockSpec((tp, CP), lambda i: (i, 0))

    # ---- pass 1: conv + per-channel partial batch statistics ---------------------
    stats_shape = jax.ShapeDtypeStruct((nt, 2, CP), jnp.float32)
    if store_conv:
        y_spec = pl.BlockSpec((tp, 2 * CP), lambda i: (i, 0))
        stats, y_conv = pl.pallas_call(
            _conv_stats_store_kernel,
            out_shape=(stats_shape, jax.ShapeDtypeStruct((NP_pad, 2 * CP), op_dtype)),
            grid=(nt,),
            in_specs=[x_spec, w_spec],
            out_specs=(stats_spec, y_spec),
            compiler_params=cparams,
        )(x_pairs, w_p)
    else:
        stats = pl.pallas_call(
            _conv_stats_kernel,
            out_shape=stats_shape,
            grid=(nt,),
            in_specs=[x_spec, w_spec],
            out_specs=stats_spec,
            compiler_params=cparams,
        )(x_pairs, w_p)

    # ---- tiny per-channel epilogue: fold mean/var/gamma/beta into scale/shift ----
    sums = jnp.sum(stats, axis=0)                                    # (2, CP)
    mean = sums[0] / NL
    # One-pass variance (E[x^2] - E[x]^2); the clamp guards catastrophic cancellation
    # for very large N*L / large conv means (precision can drift vs. a true two-pass).
    var = jnp.maximum(sums[1] / NL - mean * mean, 0.0)
    gamma_p = jnp.pad(gamma.astype(jnp.float32), (0, CP - Cout))
    beta_p = jnp.pad(beta.astype(jnp.float32), (0, CP - Cout))
    scale = gamma_p * jax.lax.rsqrt(var + EPS)
    shift = (beta_p - mean * scale).reshape(1, CP)
    scale = scale.reshape(1, CP)

    # ---- pass 2: BN + ReLU + MaxPool(2), lane-dense output in the compute dtype --
    out_shape = jax.ShapeDtypeStruct((NP_pad, CP), op_dtype)
    if store_conv:
        out_pairs = pl.pallas_call(
            _bn_relu_pool_kernel,
            out_shape=out_shape,
            grid=(nt,),
            in_specs=[y_spec, vec_spec, vec_spec],
            out_specs=out_spec,
            compiler_params=cparams,
        )(y_conv, scale, shift)
    else:
        # Fold the BN scale into the weight columns so the kernel epilogue is a single
        # add (+ max/relu) instead of mul+add per element (no f32 FMA on v5e/v6e).
        w2 = (w_f32 * scale).astype(op_dtype)
        out_pairs = pl.pallas_call(
            _conv_bn_relu_pool_kernel,
            out_shape=out_shape,
            grid=(nt,),
            in_specs=[x_spec, w_spec, vec_spec],
            out_specs=out_spec,
            compiler_params=cparams,
        )(x_pairs, w2, shift)

    # (NP_pad, CP) -> (N, L/2, Cout) -> (N, Cout, L/2); drop row and lane padding.
    out = out_pairs[:NP].reshape(N, L // 2, CP)[:, :, :Cout]
    return jnp.transpose(out, (0, 2, 1)).astype(x.dtype)


# -----------------------------------------------------------------------------------
# pure-JAX reference (PyTorch forward, training-mode BatchNorm)
# -----------------------------------------------------------------------------------
def reference(x, w, b, gamma, beta, *, padding=1):
    y = jax.lax.conv_general_dilated(
        x, w, window_strides=(1,), padding=[(padding, padding)],
        dimension_numbers=("NCH", "OIH", "NCH"))
    y = y + b[None, :, None]
    mean = jnp.mean(y, axis=(0, 2), keepdims=True)
    var = jnp.mean((y - mean) ** 2, axis=(0, 2), keepdims=True)
    y = (y - mean) / jnp.sqrt(var + EPS)
    y = y * gamma[None, :, None] + beta[None, :, None]
    y = jnp.maximum(y, 0.0)
    return jnp.maximum(y[:, :, 0::2], y[:, :, 1::2])


if __name__ == "__main__":
    # Small shapes implied by the module: Conv1d over (N, C_in, L).
    N, Cin, Cout, L, K = 2, 4, 8, 16, 3

    key = jax.random.PRNGKey(0)
    kx, kw, kb = jax.random.split(key, 3)

    x = jax.random.normal(kx, (N, Cin, L), dtype=jnp.float32)
    # PyTorch-default-style init: U(-1/sqrt(fan_in), +1/sqrt(fan_in)).
    bound = 1.0 / jnp.sqrt(jnp.float32(Cin * K))
    w = jax.random.uniform(kw, (Cout, Cin, K), jnp.float32, -bound, bound)
    b = jax.random.uniform(kb, (Cout,), jnp.float32, -bound, bound)
    gamma = jnp.ones((Cout,), jnp.float32)   # BatchNorm default weight
    beta = jnp.zeros((Cout,), jnp.float32)   # BatchNorm default bias

    ref = reference(x, w, b, gamma, beta)

    # 1) Default path: bf16 matmul operands / bf16 pallas output, recompute pass 2.
    out = jax.block_until_ready(conv_block(x, w, b, gamma, beta))
    assert out.shape == (N, Cout, L // 2), out.shape
    assert out.dtype == x.dtype, out.dtype
    assert jnp.allclose(out, ref, rtol=1e-1, atol=1e-1), float(jnp.max(jnp.abs(out - ref)))

    # 2) Strict f32 path, forced small tile -> multi-step pipelined grid.
    out32 = jax.block_until_ready(
        conv_block(x, w, b, gamma, beta, compute_dtype=None, pairs_per_tile=8))
    assert jnp.allclose(out32, ref, rtol=1e-4, atol=1e-4), \
        float(jnp.max(jnp.abs(out32 - ref)))

    # 3) store_conv path (pass 1 writes the pre-BN conv, pass 2 is elementwise only).
    out_sc = jax.block_until_ready(
        conv_block(x, w, b, gamma, beta, compute_dtype=None, store_conv=True))
    assert jnp.allclose(out_sc, ref, rtol=1e-4, atol=1e-4), \
        float(jnp.max(jnp.abs(out_sc - ref)))

    # 4) Ragged row count: N*L/2 not a multiple of the tile -> zero-row padding path.
    L2 = 18
    x2 = jax.random.normal(kx, (N, Cin, L2), dtype=jnp.float32)
    ref2 = reference(x2, w, b, gamma, beta)
    out2 = jax.block_until_ready(
        conv_block(x2, w, b, gamma, beta, compute_dtype=None, pairs_per_tile=8))
    assert out2.shape == (N, Cout, L2 // 2), out2.shape
    assert jnp.allclose(out2, ref2, rtol=1e-4, atol=1e-4), \
        float(jnp.max(jnp.abs(out2 - ref2)))

    print("KERNEL_OK")
</pallas_src>

<mosaic_0001>
module attributes {stable_mosaic.version = 11 : i64} {
  func.func @_conv_stats_kernel(%arg0: i32, %arg1: memref<16x24xbf16, #tpu.memory_space<vmem>>, %arg2: memref<12x128xbf16, #tpu.memory_space<vmem>>, %arg3: memref<1x2x128xf32, #tpu.memory_space<vmem>>) attributes {dimension_semantics = [#tpu.dimension_semantics<parallel>], iteration_bounds = array<i64: 1>, scalar_prefetch = 0 : i64, scratch_operands = 0 : i64, tpu.core_type = #tpu.core_type<tc>, window_params = [{transform_indices = @transform_0, window_bounds = array<i64: 16, 24>}, {pipeline_mode = #tpu.pipeline_mode<synchronous>, transform_indices = @transform_1, window_bounds = array<i64: 12, 128>}, {transform_indices = @transform_2, window_bounds = array<i64: 1, 2, 128>}]} {
    %c0 = arith.constant 0 : index
    %c0_0 = arith.constant 0 : index
    %0 = vector.load %arg2[%c0, %c0_0] : memref<12x128xbf16, #tpu.memory_space<vmem>>, vector<12x128xbf16>
    %c0_1 = arith.constant 0 : index
    %c0_2 = arith.constant 0 : index
    %1 = vector.load %arg1[%c0_1, %c0_2] : memref<16x24xbf16, #tpu.memory_space<vmem>>, vector<16x12xbf16>
    %cst = arith.constant dense<0.000000e+00> : vector<16x128xf32>
    %2 = tpu.matmul %1, %0, %cst {dimension_numbers = #tpu.dot_dimension_numbers<[1], [0], [0], [1], [0, 0, 1, 1], [], []>} : vector<16x12xbf16>, vector<12x128xbf16>, vector<16x128xf32> -> vector<16x128xf32>
    %c0_3 = arith.constant 0 : index
    %c12 = arith.constant 12 : index
    %3 = vector.load %arg1[%c0_3, %c12] : memref<16x24xbf16, #tpu.memory_space<vmem>>, vector<16x12xbf16>
    %cst_4 = arith.constant dense<0.000000e+00> : vector<16x128xf32>
    %4 = tpu.matmul %3, %0, %cst_4 {dimension_numbers = #tpu.dot_dimension_numbers<[1], [0], [0], [1], [0, 0, 1, 1], [], []>} : vector<16x12xbf16>, vector<12x128xbf16>, vector<16x128xf32> -> vector<16x128xf32>
    %cst_5 = arith.constant dense<0.000000e+00> : vector<128xf32>
    %5 = vector.multi_reduction <add>, %2, %cst_5 [0] : vector<16x128xf32> to vector<128xf32>
    %6 = vector.shape_cast %5 : vector<128xf32> to vector<1x128xf32>
    %cst_6 = arith.constant dense<0.000000e+00> : vector<128xf32>
    %7 = vector.multi_reduction <add>, %4, %cst_6 [0] : vector<16x128xf32> to vector<128xf32>
    %8 = vector.shape_cast %7 : vector<128xf32> to vector<1x128xf32>
    %9 = arith.addf %6, %8 : vector<1x128xf32>
    %10 = arith.mulf %2, %2 : vector<16x128xf32>
    %cst_7 = arith.constant dense<0.000000e+00> : vector<128xf32>
    %11 = vector.multi_reduction <add>, %10, %cst_7 [0] : vector<16x128xf32> to vector<128xf32>
    %12 = vector.shape_cast %11 : vector<128xf32> to vector<1x128xf32>
    %13 = arith.mulf %4, %4 : vector<16x128xf32>
    %cst_8 = arith.constant dense<0.000000e+00> : vector<128xf32>
    %14 = vector.multi_reduction <add>, %13, %cst_8 [0] : vector<16x128xf32> to vector<128xf32>
    %15 = vector.shape_cast %14 : vector<128xf32> to vector<1x128xf32>
    %16 = arith.addf %12, %15 : vector<1x128xf32>
    %17 = tpu.concatenate %9, %16 in 0 : vector<1x128xf32>, vector<1x128xf32> -> vector<2x128xf32>
    %18 = vector.shape_cast %17 : vector<2x128xf32> to vector<1x2x128xf32>
    %c0_9 = arith.constant 0 : index
    %c0_10 = arith.constant 0 : index
    %c0_11 = arith.constant 0 : index
    %19 = vector.load %arg3[%c0_9, %c0_10, %c0_11] : memref<1x2x128xf32, #tpu.memory_space<vmem>>, vector<1x2x128xf32>
    tpu.vector_store %arg3[%c0_9, %c0_10, %c0_11], %18 {strides = array<i32>} : memref<1x2x128xf32, #tpu.memory_space<vmem>>, vector<1x2x128xf32>,
    return
  }
  func.func @transform_0(%arg0: i32) -> (i32, i32) {
    %c0_i32 = arith.constant 0 : i32
    %c0_i32_0 = arith.constant 0 : i32
    return %arg0, %c0_i32 : i32, i32
  }
  func.func @transform_1(%arg0: i32) -> (i32, i32) {
    %c0_i32 = arith.constant 0 : i32
    %c0_i32_0 = arith.constant 0 : i32
    %c0_i32_1 = arith.constant 0 : i32
    return %c0_i32, %c0_i32_0 : i32, i32
  }
  func.func @transform_2(%arg0: i32) -> (i32, i32, i32) {
    %c0_i32 = arith.constant 0 : i32
    %c0_i32_0 = arith.constant 0 : i32
    %c0_i32_1 = arith.constant 0 : i32
    return %arg0, %c0_i32, %c0_i32_0 : i32, i32, i32
  }
}

</mosaic_0001>

<bundles_post_ra>
// kernel: tpu_custom_call.1
= control target key start
LH: loop header
LB: loop body
LE: loop exit
PB: predicated region body
PF: predicated region fallthrough
CT: control target
= control target key end

     0   :  { %7 = vsyncpa [#allocation3], 0  ;;  %s281_s0 = inlined_call_operand.hbm [shape: bf16[16,24], index: 0, kind: input, shape index: {}]   ;;  %s282_s1 = inlined_call_operand.hbm [shape: bf16[12,128], index: 1, kind: input, shape index: {}]   ;;  %s283_s2 = inlined_call_operand.hbm [shape: f32[1,2,128], index: 2, kind: output, shape index: {}]  }
   0x1   :  { %8 = vsyncpa [#allocation6], 0 }
   0x2   :  { %9 = vsyncpa [#allocation4], 0  ;;  %s14_s11 = sshll.u32 %s281_s0, 4  ;;  %s251_s12 = smov [#allocation2]   ;;  %s15_s11 = int_to_ptr.hbm [resolvable:$true] %s14_s11 }
   0x3   :  { %s16_s13 = sshll.u32 %s251_s12, 4  ;;  %s27_s16 = sshll.u32 %s282_s1, 4  ;;  %s17_s13 = int_to_ptr.vmem [resolvable:$true] %s16_s13  ;;  %s28_s16 = int_to_ptr.hbm [resolvable:$true] %s27_s16 }
   0x4   :  { %s252_s17 = smov 64   ;;  %s253_s18 = smov 4  }
   0x5   :  { %22 = dma.hbm_to_vmem [thread:$0]  %s15_s11, 128, %s17_s13, [#allocation3], %s252_s17, %s252_s17, %s253_s18  }
   0x6   :  { %s254_s19 = smov [#allocation5]  }
   0x7   :  { %s29_s20 = sshll.u32 %s254_s19, 4  ;;  %s30_s20 = int_to_ptr.vmem [resolvable:$true] %s29_s20 }
   0x8   :  { %35 = dma.hbm_to_vmem [thread:$0]  %s28_s16, 128, %s30_s20, [#allocation6], %s252_s17, %s252_s17, %s253_s18  }
   0x9   :  { %245 = dma.done.wait [#allocation3], 128  }
   0xa   :  { %246 = vsyncadd [#allocation3], 4294967168 }
   0xb   :  { %247 = dma.done.wait [#allocation6], 128  }
   0xc   :  { %248 = vsyncadd [#allocation6], 4294967168  ;;  %v166_v0 = vld [vmem:[#allocation2] sm:$0xff]  ;;  %v161_v1 = vld [vmem:[#allocation5] sm:$0xf]  ;;  %vm63_vm0 = vcmask 1045504  }
   0xd   :  { %v165_v2 = vld [vmem:[#allocation5] sm:$0x30]  ;;  %s255_s0 = smov 116   ;;  %vm59_vm1 = vcmask 97280   ;;  %s256_s1 = smov [#allocation7]   ;;  %vm134_vm2 = vcmask 1040384  }
   0xe   :  { %v162_v3 = vor.u32 %v165_v2, %v161_v1  ;;  %81 = vrot.lane.b32.xlu0 %v166_v0, %s255_s0  ;;  %s142_s21 = sshll.u32 %s256_s1, 4  ;;  %s144_s24 = sshll.u32 %s283_s2, 4  ;;  %s143_s21 = int_to_ptr.vmem [resolvable:$true] %s142_s21  ;;  %s145_s24 = int_to_ptr.hbm [resolvable:$true] %s144_s24 }
  0x10   :  { %v65_v4 = vsel %vm63_vm0, %v162_v3, 0 }
  0x11   :  { %74 = vmatpush.bf16.msra.mxu0 %v65_v4  ;;  %93 = vmatpush.bf16.msra.mxu1 %v65_v4 }
  0x14   :  { %163 = vmatmul.msk.bf16.vlgmr.msra.gmra.mxu0 %vm59_vm1, %v166_v0 }
  0x80   :  { %v82_v5 = vpop.permute.xlu0 %81 }
  0x81   :  { %164 = vmatmul.msk.bf16.vlgmr.msra.gmra.mxu1 %vm59_vm1, %v82_v5 }
  0x91   :  { %v76_v6 = vpop.f32.mrf.mxu0 }
  0x92   :  { %v115_v8 = vmul.f32 %v76_v6, %v76_v6 }
  0x99   :  { %v78_v7 = vpop.f32.mrf.mxu0 }
  0x9a   :  { %v116_v9 = vmul.f32 %v78_v7, %v78_v7  ;;  %v100_v10 = vadd.f32 %v78_v7, %v76_v6 }
  0x9c   :  { %v117_v11 = vadd.f32 %v116_v9, %v115_v8  ;;  %v101_v13 = vrot.slane %v100_v10, 4 }
  0x9e   :  { %v118_v14 = vrot.slane %v117_v11, 4  ;;  %v102_v15 = vadd.f32 %v101_v13, %v100_v10 }
  0xa0   :  { %v119_v16 = vadd.f32 %v118_v14, %v117_v11  ;;  %v103_v21 = vrot.slane %v102_v15, 2 }
  0xa2   :  { %v120_v22 = vrot.slane %v119_v16, 2  ;;  %v104_v27 = vadd.f32 %v103_v21, %v102_v15 }
  0xa4   :  { %v121_v28 = vadd.f32 %v120_v22, %v119_v16  ;;  %v105_v33 = vrot.slane %v104_v27, 1 }
  0xa6   :  { %v122_v34 = vrot.slane %v121_v28, 1  ;;  %v106_v39 = vadd.f32 %v105_v33, %v104_v27 }
  0xa8   :  { %v123_v40 = vadd.f32 %v122_v34, %v121_v28 }
  0xfe   :  { %v95_v12 = vpop.f32.mrf.mxu1 }
  0xff   :  { %v124_v18 = vmul.f32 %v95_v12, %v95_v12 }
 0x106   :  { %v97_v17 = vpop.f32.mrf.mxu1 }
 0x107   :  { %v107_v19 = vadd.f32 %v97_v17, %v95_v12  ;;  %v125_v20 = vmul.f32 %v97_v17, %v97_v17 }
 0x109   :  { %v108_v23 = vrot.slane %v107_v19, 4  ;;  %v126_v24 = vadd.f32 %v125_v20, %v124_v18 }
 0x10b   :  { %v109_v25 = vadd.f32 %v108_v23, %v107_v19  ;;  %v127_v26 = vrot.slane %v126_v24, 4 }
 0x10d   :  { %v110_v29 = vrot.slane %v109_v25, 2  ;;  %v128_v30 = vadd.f32 %v127_v26, %v126_v24 }
 0x10f   :  { %v111_v31 = vadd.f32 %v110_v29, %v109_v25  ;;  %v129_v32 = vrot.slane %v128_v30, 2 }
 0x111   :  { %v112_v35 = vrot.slane %v111_v31, 1  ;;  %v130_v36 = vadd.f32 %v129_v32, %v128_v30 }
 0x113   :  { %v113_v37 = vadd.f32 %v112_v35, %v111_v31  ;;  %v131_v38 = vrot.slane %v130_v36, 1 }
 0x115   :  { %v132_v41 = vadd.f32 %v131_v38, %v130_v36  ;;  %v114_v42 = vadd.f32 %v113_v37, %v106_v39 }
 0x117   :  { %v133_v43 = vadd.f32 %v132_v41, %v123_v40 }
 0x119   :  { %v135_v44 = vsel %vm134_vm2, %v114_v42, %v133_v43 }
 0x11a   :  { %136 = vst [vmem:[#allocation7] sm:$0x3] %v135_v44 }
 0x11b   :  { %147 = dma.vmem_to_hbm [thread:$0]  %s143_s21, 32, %s145_s24, [#allocation4]  }
 0x11c   :  { %249 = dma.done.wait [#allocation4], 32  }
 0x11d   :  { %250 = vsyncadd [#allocation4], 4294967264 }
 0x11e   :  { %152 = vsyncpa [#allocation3], 1 }
 0x11f   :  { %153 = vsyncpa [#allocation6], 1 }
 0x120   :  { %154 = vsyncpa [#allocation4], 1 }

</bundles_post_ra>
